<compile_context>
chip_gen: v5e
topology: v5e:2x2
jax: 0.10.0
libtpu: 0.0.40
codegen_flags: <defaults>
</compile_context>

<pallas_src>
import functools

import jax
import jax.numpy as jnp
from jax.experimental import pallas as pl
from jax.experimental.pallas import tpu as pltpu


def _residual_block_kernel(x_ref, shift_ref, wb0_ref, b0_ref, wb1_ref, b1_ref,
                           o_ref, *, dmax):
    # x_ref    : (NB, Hp, L)   row-packed, 128-lane-dense activations
    # shift_ref: (nd, M, M)    0/1 packed-row shift matrices (M = NB*Hp)
    # wb*_ref  : (nd, L, L)    banded conv matrices, one per row offset d
    # b*_ref   : (1, L)        bias tiled across (packed rows, width)
    # o_ref    : (NB, Hp, L)   output
    NB, Hp, L = x_ref.shape
    M = NB * Hp
    nd = 2 * dmax + 1

    x = x_ref[...].astype(jnp.float32).reshape(M, L)   # kept for residual add

    def conv(act, wb_ref, b_ref):
        # d == 0 term: no row shift needed.
        y = jnp.dot(act, wb_ref[dmax], preferred_element_type=jnp.float32)
        # Neighbouring packed-row terms.  The vertical shift (with zero
        # padding at the top/bottom image border) is a tiny 0/1 matmul on
        # the left, so the whole conv stays in registers + MXU: no VMEM
        # staging stores, no masked halo writes, no cross-lane shuffles.
        for t in range(nd):
            if t == dmax:
                continue
            shifted = jnp.dot(shift_ref[t], act,
                              preferred_element_type=jnp.float32)
            y = y + jnp.dot(shifted, wb_ref[t],
                            preferred_element_type=jnp.float32)
        return y + b_ref[...]                           # (M, L) + (1, L)

    y0 = conv(jnp.maximum(x, 0.0), wb0_ref, b0_ref)     # relu -> conv0 (+b0)
    y1 = conv(jnp.maximum(y0, 0.0), wb1_ref, b1_ref)    # relu -> conv1 (+b1)
    # Residual add; single full-128-lane store.
    o_ref[...] = (y1 + x).reshape(NB, Hp, L).astype(o_ref.dtype)


def _width_banded(w_taps, width):
    """Fold the width taps + channel mixing of one kh row into a matrix.

    w_taps: (K, Cin, Cout) == w_hwio[kh].  Returns B with
      B[wi*Cin + ci, wo*Cout + co] = w_taps[wi - wo + pad, ci, co]
    when the tap index is in range, else 0, so (row @ B) is the SAME conv
    along width (zero padding handled by the band structure).
    """
    K, Cin, Cout = w_taps.shape
    pad = (K - 1) // 2
    B = jnp.zeros((width, Cin, width, Cout), jnp.float32)
    for wo in range(width):
        for kw in range(K):
            wi = wo + kw - pad
            if 0 <= wi < width:
                B = B.at[wi, :, wo, :].set(w_taps[kw].astype(jnp.float32))
    return B.reshape(width * Cin, width * Cout)


def _packed_conv_matrices(w_hwio, width, pack):
    """Banded matrices for a SAME conv on row-packed activations.

    Band t corresponds to packed-row offset d = t - dmax:
      out_packed_row[g] += act_packed_row[g + d] @ band[t]
    """
    K, _, Cin, Cout = w_hwio.shape
    pad = (K - 1) // 2
    WCi, WCo = width * Cin, width * Cout
    dmax = (pad + pack - 1) // pack
    bw = [_width_banded(w_hwio[kh], width) for kh in range(K)]
    bands = []
    for d in range(-dmax, dmax + 1):
        Md = jnp.zeros((pack * WCi, pack * WCo), jnp.float32)
        for ein in range(pack):        # input row position inside the pack
            for eout in range(pack):   # output row position inside the pack
                kh = pack * d + ein - eout + pad
                if 0 <= kh < K:
                    Md = Md.at[ein * WCi:(ein + 1) * WCi,
                               eout * WCo:(eout + 1) * WCo].set(bw[kh])
        bands.append(Md)
    return jnp.stack(bands, axis=0)    # (nd, L, L)


def _shift_matrices(m_rows, rows_per_image, dmax):
    """0/1 matrices S_d with (S_d @ act)[i] = act[i + d] within one image."""
    i = jnp.arange(m_rows)[:, None]
    j = jnp.arange(m_rows)[None, :]
    same_image = (i // rows_per_image) == (j // rows_per_image)
    mats = []
    for d in range(-dmax, dmax + 1):
        mats.append(jnp.where(same_image & (j == i + d), 1.0, 0.0))
    return jnp.stack(mats, axis=0).astype(jnp.float32)   # (nd, M, M)


def residual_block_nhwc(x, w0, b0, w1, b1, *, batch_block=1):
    """x: (N,H,W,C) f32; w*: (K,K,Cin,Cout) HWIO; b*: (C,)."""
    N, H, W, C = x.shape
    K = w0.shape[0]
    assert K % 2 == 1, "SAME-padding derivation assumes an odd kernel size"
    pad = (K - 1) // 2

    # Pack adjacent image rows so activation slabs are 128-lane dense
    # (W*C = 64 here -> pack 2 rows -> 128 lanes).  Falls back to pack=1
    # (masked stores, still correct) if no packing factor fits.
    pack = 1
    for cand in (1, 2, 4, 8):
        if H % cand == 0 and (cand * W * C) % 128 == 0:
            pack = cand
            break
    L = pack * W * C
    Hp = H // pack

    NB = N if batch_block is None else batch_block
    assert N % NB == 0, "batch_block must divide N"
    M = NB * Hp
    dmax = (pad + pack - 1) // pack
    nd = 2 * dmax + 1

    x_packed = x.reshape(N, Hp, L)                      # lane-dense slabs
    wb0 = _packed_conv_matrices(w0, W, pack)            # (nd, L, L)
    wb1 = _packed_conv_matrices(w1, W, pack)
    b0t = jnp.tile(b0.astype(jnp.float32), pack * W).reshape(1, L)
    b1t = jnp.tile(b1.astype(jnp.float32), pack * W).reshape(1, L)
    shifts = _shift_matrices(M, Hp, dmax)               # (nd, M, M)

    kernel = functools.partial(_residual_block_kernel, dmax=dmax)

    out_packed = pl.pallas_call(
        kernel,
        out_shape=jax.ShapeDtypeStruct((N, Hp, L), x.dtype),
        grid=(N // NB,),
        in_specs=[
            pl.BlockSpec((NB, Hp, L), lambda n: (n, 0, 0)),     # activations
            pl.BlockSpec((nd, M, M), lambda n: (0, 0, 0)),      # row shifts
            pl.BlockSpec((nd, L, L), lambda n: (0, 0, 0)),      # conv0 bands
            pl.BlockSpec((1, L), lambda n: (0, 0)),             # conv0 bias
            pl.BlockSpec((nd, L, L), lambda n: (0, 0, 0)),      # conv1 bands
            pl.BlockSpec((1, L), lambda n: (0, 0)),             # conv1 bias
        ],
        out_specs=pl.BlockSpec((NB, Hp, L), lambda n: (n, 0, 0)),
        compiler_params=pltpu.CompilerParams(
            dimension_semantics=("parallel",),        # both TCs on v7x
            vmem_limit_bytes=32 * 1024 * 1024),       # explicit (v7x-safe)
    )(x_packed, shifts, wb0, b0t, wb1, b1t)

    return out_packed.reshape(N, H, W, C)


def residual_block(x_nchw, w0_oihw, b0, w1_oihw, b1):
    """PyTorch-layout entry point: x (N,C,H,W), weights (Cout,Cin,kH,kW)."""
    x = jnp.transpose(x_nchw, (0, 2, 3, 1))               # NCHW -> NHWC
    w0 = jnp.transpose(w0_oihw, (2, 3, 1, 0))             # OIHW -> HWIO
    w1 = jnp.transpose(w1_oihw, (2, 3, 1, 0))
    y = residual_block_nhwc(x, w0, b0, w1, b1)
    return jnp.transpose(y, (0, 3, 1, 2))                 # NHWC -> NCHW


def residual_block_reference(x, w0, b0, w1, b1):
    """Plain-JAX reference mirroring the PyTorch module (NCHW / OIHW)."""
    K = w0.shape[-1]
    p = (K - 1) // 2

    def conv(h, w, b):
        y = jax.lax.conv_general_dilated(
            h, w, window_strides=(1, 1), padding=((p, p), (p, p)),
            dimension_numbers=("NCHW", "OIHW", "NCHW"))
        return y + b.reshape(1, -1, 1, 1)

    h = conv(jnp.maximum(x, 0.0), w0, b0)
    h = conv(jnp.maximum(h, 0.0), w1, b1)
    return h + x


if __name__ == "__main__":
    # Small shapes consistent with the module: batch=2, channels=4, spatial=16.
    N, C, H, W, K = 2, 4, 16, 16, 3

    key = jax.random.PRNGKey(0)
    kx, kw0, kb0, kw1, kb1 = jax.random.split(key, 5)

    x = jax.random.normal(kx, (N, C, H, W), dtype=jnp.float32)
    scale = 1.0 / (C * K * K) ** 0.5
    w0 = jax.random.normal(kw0, (C, C, K, K), dtype=jnp.float32) * scale
    b0 = jax.random.normal(kb0, (C,), dtype=jnp.float32) * scale
    w1 = jax.random.normal(kw1, (C, C, K, K), dtype=jnp.float32) * scale
    b1 = jax.random.normal(kb1, (C,), dtype=jnp.float32) * scale

    out = jax.block_until_ready(residual_block(x, w0, b0, w1, b1))
    ref = jax.block_until_ready(residual_block_reference(x, w0, b0, w1, b1))

    assert out.shape == (N, C, H, W)
    assert jnp.allclose(out, ref, atol=1e-4, rtol=1e-4), "mismatch vs reference conv"

    print("KERNEL_OK")
</pallas_src>

<mosaic_0001>
module attributes {stable_mosaic.version = 11 : i64} {
  func.func @_residual_block_kernel(%arg0: i32, %arg1: memref<1x8x128xf32, #tpu.memory_space<vmem>>, %arg2: memref<3x8x8xf32, #tpu.memory_space<vmem>>, %arg3: memref<3x128x128xf32, #tpu.memory_space<vmem>>, %arg4: memref<1x128xf32, #tpu.memory_space<vmem>>, %arg5: memref<3x128x128xf32, #tpu.memory_space<vmem>>, %arg6: memref<1x128xf32, #tpu.memory_space<vmem>>, %arg7: memref<1x8x128xf32, #tpu.memory_space<vmem>>) attributes {dimension_semantics = [#tpu.dimension_semantics<parallel>], iteration_bounds = array<i64: 2>, scalar_prefetch = 0 : i64, scratch_operands = 0 : i64, tpu.core_type = #tpu.core_type<tc>, window_params = [{transform_indices = @transform_0, window_bounds = array<i64: 1, 8, 128>}, {pipeline_mode = #tpu.pipeline_mode<synchronous>, transform_indices = @transform_1, window_bounds = array<i64: 3, 8, 8>}, {pipeline_mode = #tpu.pipeline_mode<synchronous>, transform_indices = @transform_2, window_bounds = array<i64: 3, 128, 128>}, {pipeline_mode = #tpu.pipeline_mode<synchronous>, transform_indices = @transform_3, window_bounds = array<i64: 1, 128>}, {pipeline_mode = #tpu.pipeline_mode<synchronous>, transform_indices = @transform_4, window_bounds = array<i64: 3, 128, 128>}, {pipeline_mode = #tpu.pipeline_mode<synchronous>, transform_indices = @transform_5, window_bounds = array<i64: 1, 128>}, {transform_indices = @transform_6, window_bounds = array<i64: 1, 8, 128>}]} {
    %c0 = arith.constant 0 : index
    %c0_0 = arith.constant 0 : index
    %c0_1 = arith.constant 0 : index
    %0 = vector.load %arg1[%c0, %c0_0, %c0_1] : memref<1x8x128xf32, #tpu.memory_space<vmem>>, vector<1x8x128xf32>
    %1 = vector.shape_cast %0 : vector<1x8x128xf32> to vector<8x128xf32>
    %cst = arith.constant 0.000000e+00 : f32
    %2 = vector.broadcast %cst : f32 to vector<8x128xf32>
    %3 = arith.maximumf %1, %2 : vector<8x128xf32>
    %c1 = arith.constant 1 : index
    %c0_2 = arith.constant 0 : index
    %c0_3 = arith.constant 0 : index
    %4 = vector.load %arg3[%c1, %c0_2, %c0_3] : memref<3x128x128xf32, #tpu.memory_space<vmem>>, vector<1x128x128xf32>
    %5 = vector.shape_cast %4 : vector<1x128x128xf32> to vector<128x128xf32>
    %cst_4 = arith.constant dense<0.000000e+00> : vector<8x128xf32>
    %6 = tpu.matmul %3, %5, %cst_4 {dimension_numbers = #tpu.dot_dimension_numbers<[1], [0], [0], [1], [0, 0, 1, 1], [], []>} : vector<8x128xf32>, vector<128x128xf32>, vector<8x128xf32> -> vector<8x128xf32>
    %c0_5 = arith.constant 0 : index
    %c0_6 = arith.constant 0 : index
    %c0_7 = arith.constant 0 : index
    %7 = vector.load %arg2[%c0_5, %c0_6, %c0_7] : memref<3x8x8xf32, #tpu.memory_space<vmem>>, vector<1x8x8xf32>
    %8 = vector.shape_cast %7 : vector<1x8x8xf32> to vector<8x8xf32>
    %cst_8 = arith.constant dense<0.000000e+00> : vector<8x128xf32>
    %9 = tpu.matmul %8, %3, %cst_8 {dimension_numbers = #tpu.dot_dimension_numbers<[1], [0], [0], [1], [0, 0, 1, 1], [], []>} : vector<8x8xf32>, vector<8x128xf32>, vector<8x128xf32> -> vector<8x128xf32>
    %c0_9 = arith.constant 0 : index
    %c0_10 = arith.constant 0 : index
    %c0_11 = arith.constant 0 : index
    %10 = vector.load %arg3[%c0_9, %c0_10, %c0_11] : memref<3x128x128xf32, #tpu.memory_space<vmem>>, vector<1x128x128xf32>
    %11 = vector.shape_cast %10 : vector<1x128x128xf32> to vector<128x128xf32>
    %cst_12 = arith.constant dense<0.000000e+00> : vector<8x128xf32>
    %12 = tpu.matmul %9, %11, %cst_12 {dimension_numbers = #tpu.dot_dimension_numbers<[1], [0], [0], [1], [0, 0, 1, 1], [], []>} : vector<8x128xf32>, vector<128x128xf32>, vector<8x128xf32> -> vector<8x128xf32>
    %13 = arith.addf %6, %12 : vector<8x128xf32>
    %c2 = arith.constant 2 : index
    %c0_13 = arith.constant 0 : index
    %c0_14 = arith.constant 0 : index
    %14 = vector.load %arg2[%c2, %c0_13, %c0_14] : memref<3x8x8xf32, #tpu.memory_space<vmem>>, vector<1x8x8xf32>
    %15 = vector.shape_cast %14 : vector<1x8x8xf32> to vector<8x8xf32>
    %cst_15 = arith.constant dense<0.000000e+00> : vector<8x128xf32>
    %16 = tpu.matmul %15, %3, %cst_15 {dimension_numbers = #tpu.dot_dimension_numbers<[1], [0], [0], [1], [0, 0, 1, 1], [], []>} : vector<8x8xf32>, vector<8x128xf32>, vector<8x128xf32> -> vector<8x128xf32>
    %c2_16 = arith.constant 2 : index
    %c0_17 = arith.constant 0 : index
    %c0_18 = arith.constant 0 : index
    %17 = vector.load %arg3[%c2_16, %c0_17, %c0_18] : memref<3x128x128xf32, #tpu.memory_space<vmem>>, vector<1x128x128xf32>
    %18 = vector.shape_cast %17 : vector<1x128x128xf32> to vector<128x128xf32>
    %cst_19 = arith.constant dense<0.000000e+00> : vector<8x128xf32>
    %19 = tpu.matmul %16, %18, %cst_19 {dimension_numbers = #tpu.dot_dimension_numbers<[1], [0], [0], [1], [0, 0, 1, 1], [], []>} : vector<8x128xf32>, vector<128x128xf32>, vector<8x128xf32> -> vector<8x128xf32>
    %20 = arith.addf %13, %19 : vector<8x128xf32>
    %c0_20 = arith.constant 0 : index
    %c0_21 = arith.constant 0 : index
    %21 = vector.load %arg4[%c0_20, %c0_21] : memref<1x128xf32, #tpu.memory_space<vmem>>, vector<1x128xf32>
    %22 = vector.broadcast %21 : vector<1x128xf32> to vector<8x128xf32>
    %23 = arith.addf %20, %22 : vector<8x128xf32>
    %cst_22 = arith.constant 0.000000e+00 : f32
    %24 = vector.broadcast %cst_22 : f32 to vector<8x128xf32>
    %25 = arith.maximumf %23, %24 : vector<8x128xf32>
    %c1_23 = arith.constant 1 : index
    %c0_24 = arith.constant 0 : index
    %c0_25 = arith.constant 0 : index
    %26 = vector.load %arg5[%c1_23, %c0_24, %c0_25] : memref<3x128x128xf32, #tpu.memory_space<vmem>>, vector<1x128x128xf32>
    %27 = vector.shape_cast %26 : vector<1x128x128xf32> to vector<128x128xf32>
    %cst_26 = arith.constant dense<0.000000e+00> : vector<8x128xf32>
    %28 = tpu.matmul %25, %27, %cst_26 {dimension_numbers = #tpu.dot_dimension_numbers<[1], [0], [0], [1], [0, 0, 1, 1], [], []>} : vector<8x128xf32>, vector<128x128xf32>, vector<8x128xf32> -> vector<8x128xf32>
    %c0_27 = arith.constant 0 : index
    %c0_28 = arith.constant 0 : index
    %c0_29 = arith.constant 0 : index
    %29 = vector.load %arg2[%c0_27, %c0_28, %c0_29] : memref<3x8x8xf32, #tpu.memory_space<vmem>>, vector<1x8x8xf32>
    %30 = vector.shape_cast %29 : vector<1x8x8xf32> to vector<8x8xf32>
    %cst_30 = arith.constant dense<0.000000e+00> : vector<8x128xf32>
    %31 = tpu.matmul %30, %25, %cst_30 {dimension_numbers = #tpu.dot_dimension_numbers<[1], [0], [0], [1], [0, 0, 1, 1], [], []>} : vector<8x8xf32>, vector<8x128xf32>, vector<8x128xf32> -> vector<8x128xf32>
    %c0_31 = arith.constant 0 : index
    %c0_32 = arith.constant 0 : index
    %c0_33 = arith.constant 0 : index
    %32 = vector.load %arg5[%c0_31, %c0_32, %c0_33] : memref<3x128x128xf32, #tpu.memory_space<vmem>>, vector<1x128x128xf32>
    %33 = vector.shape_cast %32 : vector<1x128x128xf32> to vector<128x128xf32>
    %cst_34 = arith.constant dense<0.000000e+00> : vector<8x128xf32>
    %34 = tpu.matmul %31, %33, %cst_34 {dimension_numbers = #tpu.dot_dimension_numbers<[1], [0], [0], [1], [0, 0, 1, 1], [], []>} : vector<8x128xf32>, vector<128x128xf32>, vector<8x128xf32> -> vector<8x128xf32>
    %35 = arith.addf %28, %34 : vector<8x128xf32>
    %c2_35 = arith.constant 2 : index
    %c0_36 = arith.constant 0 : index
    %c0_37 = arith.constant 0 : index
    %36 = vector.load %arg2[%c2_35, %c0_36, %c0_37] : memref<3x8x8xf32, #tpu.memory_space<vmem>>, vector<1x8x8xf32>
    %37 = vector.shape_cast %36 : vector<1x8x8xf32> to vector<8x8xf32>
    %cst_38 = arith.constant dense<0.000000e+00> : vector<8x128xf32>
    %38 = tpu.matmul %37, %25, %cst_38 {dimension_numbers = #tpu.dot_dimension_numbers<[1], [0], [0], [1], [0, 0, 1, 1], [], []>} : vector<8x8xf32>, vector<8x128xf32>, vector<8x128xf32> -> vector<8x128xf32>
    %c2_39 = arith.constant 2 : index
    %c0_40 = arith.constant 0 : index
    %c0_41 = arith.constant 0 : index
    %39 = vector.load %arg5[%c2_39, %c0_40, %c0_41] : memref<3x128x128xf32, #tpu.memory_space<vmem>>, vector<1x128x128xf32>
    %40 = vector.shape_cast %39 : vector<1x128x128xf32> to vector<128x128xf32>
    %cst_42 = arith.constant dense<0.000000e+00> : vector<8x128xf32>
    %41 = tpu.matmul %38, %40, %cst_42 {dimension_numbers = #tpu.dot_dimension_numbers<[1], [0], [0], [1], [0, 0, 1, 1], [], []>} : vector<8x128xf32>, vector<128x128xf32>, vector<8x128xf32> -> vector<8x128xf32>
    %42 = arith.addf %35, %41 : vector<8x128xf32>
    %c0_43 = arith.constant 0 : index
    %c0_44 = arith.constant 0 : index
    %43 = vector.load %arg6[%c0_43, %c0_44] : memref<1x128xf32, #tpu.memory_space<vmem>>, vector<1x128xf32>
    %44 = vector.broadcast %43 : vector<1x128xf32> to vector<8x128xf32>
    %45 = arith.addf %42, %44 : vector<8x128xf32>
    %46 = arith.addf %45, %1 : vector<8x128xf32>
    %47 = vector.shape_cast %46 : vector<8x128xf32> to vector<1x8x128xf32>
    %c0_45 = arith.constant 0 : index
    %c0_46 = arith.constant 0 : index
    %c0_47 = arith.constant 0 : index
    %48 = vector.load %arg7[%c0_45, %c0_46, %c0_47] : memref<1x8x128xf32, #tpu.memory_space<vmem>>, vector<1x8x128xf32>
    tpu.vector_store %arg7[%c0_45, %c0_46, %c0_47], %47 {strides = array<i32>} : memref<1x8x128xf32, #tpu.memory_space<vmem>>, vector<1x8x128xf32>,
    return
  }
  func.func @transform_0(%arg0: i32) -> (i32, i32, i32) {
    %c0_i32 = arith.constant 0 : i32
    %c0_i32_0 = arith.constant 0 : i32
    %c0_i32_1 = arith.constant 0 : i32
    return %arg0, %c0_i32, %c0_i32_0 : i32, i32, i32
  }
  func.func @transform_1(%arg0: i32) -> (i32, i32, i32) {
    %c0_i32 = arith.constant 0 : i32
    %c0_i32_0 = arith.constant 0 : i32
    %c0_i32_1 = arith.constant 0 : i32
    %c0_i32_2 = arith.constant 0 : i32
    return %c0_i32, %c0_i32_0, %c0_i32_1 : i32, i32, i32
  }
  func.func @transform_2(%arg0: i32) -> (i32, i32, i32) {
    %c0_i32 = arith.constant 0 : i32
    %c0_i32_0 = arith.constant 0 : i32
    %c0_i32_1 = arith.constant 0 : i32
    %c0_i32_2 = arith.constant 0 : i32
    return %c0_i32, %c0_i32_0, %c0_i32_1 : i32, i32, i32
  }
  func.func @transform_3(%arg0: i32) -> (i32, i32) {
    %c0_i32 = arith.constant 0 : i32
    %c0_i32_0 = arith.constant 0 : i32
    %c0_i32_1 = arith.constant 0 : i32
    return %c0_i32, %c0_i32_0 : i32, i32
  }
  func.func @transform_4(%arg0: i32) -> (i32, i32, i32) {
    %c0_i32 = arith.constant 0 : i32
    %c0_i32_0 = arith.constant 0 : i32
    %c0_i32_1 = arith.constant 0 : i32
    %c0_i32_2 = arith.constant 0 : i32
    return %c0_i32, %c0_i32_0, %c0_i32_1 : i32, i32, i32
  }
  func.func @transform_5(%arg0: i32) -> (i32, i32) {
    %c0_i32 = arith.constant 0 : i32
    %c0_i32_0 = arith.constant 0 : i32
    %c0_i32_1 = arith.constant 0 : i32
    return %c0_i32, %c0_i32_0 : i32, i32
  }
  func.func @transform_6(%arg0: i32) -> (i32, i32, i32) {
    %c0_i32 = arith.constant 0 : i32
    %c0_i32_0 = arith.constant 0 : i32
    %c0_i32_1 = arith.constant 0 : i32
    return %arg0, %c0_i32, %c0_i32_0 : i32, i32, i32
  }
}

</mosaic_0001>

<bundles_post_ra>
// kernel: tpu_custom_call.1
= control target key start
LH: loop header
LB: loop body
LE: loop exit
PB: predicated region body
PF: predicated region fallthrough
CT: control target
= control target key end

     0   :  { %11 = vsyncpa [#allocation3], 0  ;;  %s1287_s0 = inlined_call_operand.hbm [shape: f32[2,8,128], index: 0, kind: input, shape index: {}]   ;;  %s1288_s1 = inlined_call_operand.hbm [shape: f32[3,8,8], index: 1, kind: input, shape index: {}]   ;;  %s1289_s2 = inlined_call_operand.hbm [shape: f32[3,128,128], index: 2, kind: input, shape index: {}]   ;;  %s1290_s3 = inlined_call_operand.vmem [shape: f32[1,128], index: 3, kind: input, shape index: {}]   ;;  %s1291_s4 = inlined_call_operand.hbm [shape: f32[3,128,128], index: 4, kind: input, shape index: {}]   ;;  %s1292_s5 = inlined_call_operand.vmem [shape: f32[1,128], index: 5, kind: input, shape index: {}]   ;;  %s1293_s6 = inlined_call_operand.hbm [shape: f32[2,8,128], index: 6, kind: output, shape index: {}]  }
   0x1   :  { %13 = vsyncpa [#allocation3 + $0x1], 0 }
   0x2   :  { %14 = vsyncpa [#allocation6], 0 }
   0x3   :  { %15 = vsyncpa [#allocation9], 0 }
   0x4   :  { %16 = vsyncpa [#allocation4], 0 }
   0x5   :  { %18 = vsyncpa [#allocation4 + $0x1], 0  ;;  %s1100_s21 = smov 0   ;;  %s1102_s22 = smov 0  }
   0x6   :  { %s1104_s23 = smov 0   ;;  %s1106_s24 = smov 0  }
   0x7 LB: > { %s197_s27 = sshll.u32 %s1288_s1, 4  ;;  %s1124_s28 = sadd.s32 4294967295, %s1058_s24   ;;  %s1058_s24 = sphi %s1106_s24, %s1304_s24   ;;  %s1054_s23 = sphi %s1104_s23, %s1303_s23   ;;  %s1050_s22 = sphi %s1102_s22, %s1302_s22   ;;  %s1046_s21 = sphi %s1100_s21, %s1301_s21   ;;  %s198_s27 = int_to_ptr.hbm [resolvable:$true] %s197_s27 }
   0x8   : > { %p762_p0 = scmp.ge.s32.totalorder %s1058_s24, 1  ;;  %p45_p1 = scmp.eq.s32.totalorder %s1124_s28, 0 }
   0x9   : > { %p186_p2 = scmp.lt.s32.totalorder %s1058_s24, 3  ;;  %s1060_s30 = smov [#allocation5]  }
   0xa   : > { %s199_s7 = sshll.u32 %s1060_s30, 4  ;;  %s211_s10 = sshll.u32 %s1289_s2, 4  ;;  %s200_s7 = int_to_ptr.vmem [resolvable:$true] %s199_s7  ;;  %s212_s10 = int_to_ptr.hbm [resolvable:$true] %s211_s10 }
   0xb   : > { %p1129_p3 = pnand %p762_p0, %p186_p2  ;;  %s228_s14 = sshll.u32 %s1291_s4, 4  ;;  %s229_s14 = int_to_ptr.hbm [resolvable:$true] %s228_s14 }
   0xc   : > { %s1061_s15 = smov [#allocation7]   ;;  %s1062_s17 = smov 128  }
   0xd   : > { %p799_p4 = pneg %p1129_p3  ;;  %s213_s16 = sshll.u32 %s1061_s15, 4  ;;  %s214_s16 = int_to_ptr.vmem [resolvable:$true] %s213_s16 }
   0xe   : > { %s1063_s18 = smov 8   ;;  %s1064_s19 = smov [#allocation8]  }
   0xf   : > { %p1141_p6 = pnand %p799_p4, %p45_p1  ;;  %s230_s20 = sshll.u32 %s1064_s19, 4  ;;  %s231_s20 = int_to_ptr.vmem [resolvable:$true] %s230_s20 }
  0x10   : > { %s761_s25 = sadd.s32 4294967294, %s1058_s24   ;;  %s1156_s26 = sadd.s32 1, %s1058_s24  }
  0x11   : > { %802 = dma.hbm_to_vmem [thread:$0]  (!%p1141_p6), %s198_s27, 384, %s200_s7, [#allocation6], %s1062_s17, %s1062_s17, %s1063_s18  }
  0x12   : > { %805 = dma.hbm_to_vmem [thread:$0]  (!%p1141_p6), %s212_s10, 6144, %s214_s16, [#allocation6], %s1062_s17, %s1062_s17, %s1063_s18  }
  0x13   : > { %808 = dma.hbm_to_vmem [thread:$0]  (!%p1141_p6), %s229_s14, 6144, %s231_s20, [#allocation9], %s1062_s17, %s1062_s17, %s1063_s18  }
  0x14   : > { %s31_s30 = sadd.s32 1, %s1054_s23  ;;  %s28_s27 = ssub.s32 %s1058_s24, %s1156_s26 }
  0x15   : > { %p38_p7 = scmp.ne.s32.totalorder %s1054_s23, %s1050_s22  ;;  %p29_p8 = scmp.eq.s32.totalorder %s28_s27, 0 }
  0x16   : > { %p39_p9 = scmp.eq.s32.totalorder %s1058_s24, 0  ;;  %p44_p10 = scmp.ne.s32.totalorder %s1050_s22, %s1046_s21 }
  0x17   : > { %p173_p11 = scmp.eq.s32.totalorder %s1124_s28, 1  ;;  %p179_p0 = scmp.eq.s32.totalorder %s761_s25, 1 }
  0x18   : > { %s1168_s7 = scalar_select %p29_p8, %s1054_s23, %s31_s30  }
  0x19   : > { %p1172_p12 = por %p45_p1, %p44_p10  ;;  %p1176_p13 = por %p173_p11, %p38_p7 }
  0x1a   : > { %p40_p2 = por %p39_p9, %p38_p7  ;;  %s247_s10 = sand.u32 1, %s1054_s23  }
  0x1b   : > { %p1181_p4 = por %p179_p0, %p44_p10  ;;  %p820_p6 = scmp.lt.s32.totalorder %s1058_s24, 2 }
  0x1c   : > { %s767_s12 = sshll.u32 %s247_s10, 3  ;;  %s768_s13 = sshll.u32 %s1058_s24, 3 }
  0x1d   : > { %s255_s16 = scalar_lea.hbm %s1287_s0, %s768_s13  ;;  %s251_s18 = scalar_lea.vmem [#allocation2], %s767_s12 }
  0x1e   : > { %s257_s17 = sshll.u32 %s255_s16, 4  ;;  %s259_s19 = sshll.u32 %s251_s18, 4  ;;  %s258_s17 = int_to_ptr.hbm [resolvable:$true] %s257_s17  ;;  %s260_s19 = int_to_ptr.vmem [resolvable:$true] %s259_s19 }
  0x1f   : > { %p1190_p8 = pnand %p820_p6, %p40_p2  ;;  %s248_s25 = scalar_lea.sflag [#allocation3], %s247_s10 }
  0x20   : > { %s954_s30 = sshra.s32 %s258_s17, 4  ;;  %s961_s12 = scalar_lea.hbm %s1287_s0, 16  ;;  %s955_s30 = int_to_ptr.hbm [resolvable:$true] %s954_s30 }
  0x21   : > { %s956_s27 = scalar_lea.hbm %s955_s30, 8  ;;  %p958_p9 = pneg %p1190_p8 }
  0x22   : > { %p957_p7 = scmp.ne.s32.totalorder %s955_s30, %s956_s27  ;;  %p962_p0 = scmp.lt.s32.totalorder %s955_s30, %s1287_s0 }
  0x23   : > { %p963_p2 = scmp.lt.s32.totalorder %s961_s12, %s956_s27 }
  0x24   : > { %p959_p10 = pnand %p958_p9, %p957_p7 }
  0x25   : > { %p964_p6 = por %p963_p2, %p962_p0 }
  0x26   : > { %p960_p11 = pneg %p959_p10 }
  0x28   : > { %p965_p5 = pnand %p964_p6, %p960_p11 }
  0x2a   : > { %968 = shalt.err (!%p965_p5)
}
  0x2b   : > { %812 = dma.hbm_to_vmem [thread:$0]  (!%p1190_p8), %s258_s17, 128, %s260_s19, %s248_s25  }
  0x2c   : > { %268 = sbr.rel (%p1129_p3) target bundleno = 600 (0x258), region = 44  ;;  %s1207_s10 = sand.u32 (!%p1129_p3), 1, %s1050_s22  }
  0x2d   : > { %s770_s18 = sshll.u32 (!%p1129_p3), %s1207_s10, 3  ;;  %s271_s13 = scalar_lea.sflag (!%p1129_p3), [#allocation3], %s1207_s10 }
  0x2e   : > { %s274_s30 = scalar_lea.vmem (!%p1129_p3), [#allocation2], %s770_s18 }
  0x31   : > { %1029 = dma.done.wait (%p1172_p12), %s271_s13, 128  }
  0x32   : > { %1031 = vsyncadd (%p1172_p12), %s271_s13, 4294967168 }
  0x33   : > { %1033 = dma.done.wait (%p45_p1), [#allocation6], 6528  }
  0x34   : > { %1035 = vsyncadd (%p45_p1), [#allocation6], 4294960768 }
  0x35   : > { %1037 = dma.done.wait (%p45_p1), [#allocation9], 6144  }
  0x36   : > { %1039 = vsyncadd (%p45_p1), [#allocation9], 4294961152  ;;  %v1225_v0 = vld [vmem:[%s274_s30] sm:$0xff]  ;;  %v1230_v2 = vld [vmem:[#allocation5] sm:$0xff]  ;;  %vm339_vm0 = vcmask 64512   ;;  %s780_s17 = sshll.u32 %s1124_s28, 3 }
  0x37   : > { %v1228_v1 = vmax.f32 %v1225_v0, 0.0  ;;  %v1232_v3 = vld [vmem:[#allocation5 + $0x10] sm:$0xff]  ;;  %v336_v7 = vld [vmem:[#allocation7 + $0xf0] sm:$0xff]  ;;  %v335_v10 = vld [vmem:[#allocation7 + $0xe8] sm:$0xff]  ;;  %s657_s14 = scalar_lea.hbm %s1293_s6, %s780_s17  ;;  %s318_s12 = scalar_lea.vmem [#allocation10], %s770_s18 }
  0x38   : > { %v337_v4 = vld [vmem:[#allocation7 + $0xf8] sm:$0xff]  ;;  %v377_v8 = vld [vmem:[#allocation7 + $0x70] sm:$0xff]  ;;  %v376_v11 = vld [vmem:[#allocation7 + $0x68] sm:$0xff]  ;;  %s659_s15 = sshll.u32 %s318_s12, 4  ;;  %s661_s16 = sshll.u32 %s657_s14, 4  ;;  %s660_s15 = int_to_ptr.vmem [resolvable:$true] %s659_s15  ;;  %s662_s16 = int_to_ptr.hbm [resolvable:$true] %s661_s16 }
  0x39   : > { %v378_v5 = vld [vmem:[#allocation7 + $0x78] sm:$0xff]  ;;  %358 = vmatpush.msra.mxu2 %v1228_v1  ;;  %439 = vmatpush.msra.mxu3 %v1228_v1  ;;  %v459_v9 = vld [vmem:[#allocation7 + $0x170] sm:$0xff]  ;;  %v458_v12 = vld [vmem:[#allocation7 + $0x168] sm:$0xff]  ;;  %s647_s28 = scalar_lea.sflag [#allocation4], %s1207_s10  ;;  %s998_s13 = sshra.s32 %s662_s16, 4  ;;  %s999_s13 = int_to_ptr.hbm [resolvable:$true] %s998_s13 }
  0x3a   : > { %v460_v6 = vld [vmem:[#allocation7 + $0x178] sm:$0xff]  ;;  %775 = vmatmul.msk.f32.vlgmr.msra.gmra.mxu2 %vm339_vm0, %v1230_v2  ;;  %776 = vmatmul.msk.f32.vlgmr.msra.gmra.mxu3 %vm339_vm0, %v1232_v3  ;;  %v334_v13 = vld [vmem:[#allocation7 + $0xe0] sm:$0xff]  ;;  %v332_v19 = vld [vmem:[#allocation7 + $0xd0] sm:$0xff]  ;;  %s1000_s30 = scalar_lea.hbm %s999_s13, 8  ;;  %s1004_s18 = scalar_lea.hbm %s1293_s6, 16 }
  0x3b   : > { %399 = vmatpush.msrb.mxu2 %v337_v4  ;;  %379 = vmatpush.msra.mxu1 %v378_v5  ;;  %v375_v14 = vld [vmem:[#allocation7 + $0x60] sm:$0xff]  ;;  %v333_v16 = vld [vmem:[#allocation7 + $0xd8] sm:$0xff]  ;;  %v373_v20 = vld [vmem:[#allocation7 + $0x50] sm:$0xff]  ;;  %p1001_p1 = scmp.ne.s32.totalorder %s999_s13, %s1000_s30  ;;  %p1005_p12 = scmp.lt.s32.totalorder %s999_s13, %s1293_s6 }
  0x3c   : > { %461 = vmatpush.msra.mxu0 %v460_v6  ;;  %v457_v15 = vld [vmem:[#allocation7 + $0x160] sm:$0xff]  ;;  %v374_v17 = vld [vmem:[#allocation7 + $0x58] sm:$0xff]  ;;  %v455_v21 = vld [vmem:[#allocation7 + $0x150] sm:$0xff]  ;;  %p1006_p8 = scmp.lt.s32.totalorder %s1004_s18, %s1000_s30 }
  0x3d   : > { %400 = vmatpush.msrb.mxu2 %v336_v7  ;;  %380 = vmatpush.msra.mxu1 %v377_v8  ;;  %v456_v18 = vld [vmem:[#allocation7 + $0x158] sm:$0xff]  ;;  %v331_v22 = vld [vmem:[#allocation7 + $0xc8] sm:$0xff]  ;;  %v330_v24 = vld [vmem:[#allocation7 + $0xc0] sm:$0xff]  ;;  %p1002_p3 = pnand %p1001_p1, %p1176_p13 }
  0x3e   : > { %462 = vmatpush.msra.mxu0 %v459_v9  ;;  %v372_v23 = vld [vmem:[#allocation7 + $0x48] sm:$0xff]  ;;  %v371_v26 = vld [vmem:[#allocation7 + $0x40] sm:$0xff]  ;;  %v329_v28 = vld [vmem:[#allocation7 + $0xb8] sm:$0xff]  ;;  %p1007_p7 = por %p1006_p8, %p1005_p12 }
  0x3f   : > { %401 = vmatpush.msrb.mxu2 %v335_v10  ;;  %381 = vmatpush.msra.mxu1 %v376_v11  ;;  %v454_v25 = vld [vmem:[#allocation7 + $0x148] sm:$0xff]  ;;  %v453_v27 = vld [vmem:[#allocation7 + $0x140] sm:$0xff]  ;;  %v370_v29 = vld [vmem:[#allocation7 + $0x38] sm:$0xff]  ;;  %p1003_p5 = pneg %p1002_p3 }
  0x40   : > { %463 = vmatpush.msra.mxu0 %v458_v12  ;;  %v452_v30 = vld [vmem:[#allocation7 + $0x138] sm:$0xff]  ;;  %v328_v31 = vld [vmem:[#allocation7 + $0xb0] sm:$0xff]  ;;  %v327_v34 = vld [vmem:[#allocation7 + $0xa8] sm:$0xff] }
  0x41   : > { %402 = vmatpush.msrb.mxu2 %v334_v13  ;;  %382 = vmatpush.msra.mxu1 %v375_v14  ;;  %v369_v32 = vld [vmem:[#allocation7 + $0x30] sm:$0xff]  ;;  %v368_v35 = vld [vmem:[#allocation7 + $0x28] sm:$0xff]  ;;  %v326_v37 = vld [vmem:[#allocation7 + $0xa0] sm:$0xff]  ;;  %p1008_p9 = pnand %p1007_p7, %p1003_p5 }
  0x42   : > { %464 = vmatpush.msra.mxu0 %v457_v15  ;;  %v451_v33 = vld [vmem:[#allocation7 + $0x130] sm:$0xff]  ;;  %v450_v36 = vld [vmem:[#allocation7 + $0x128] sm:$0xff]  ;;  %v367_v38 = vld [vmem:[#allocation7 + $0x20] sm:$0xff] }
  0x43   : > { %403 = vmatpush.msrb.mxu2 %v333_v16  ;;  %383 = vmatpush.msra.mxu1 %v374_v17  ;;  %v449_v39 = vld [vmem:[#allocation7 + $0x120] sm:$0xff]  ;;  %v325_v40 = vld [vmem:[#allocation7 + $0x98] sm:$0xff]  ;;  %v324_v43 = vld [vmem:[#allocation7 + $0x90] sm:$0xff] }
  0x44   : > { %465 = vmatpush.msra.mxu0 %v456_v18  ;;  %v366_v41 = vld [vmem:[#allocation7 + $0x18] sm:$0xff]  ;;  %v365_v44 = vld [vmem:[#allocation7 + $0x10] sm:$0xff]  ;;  %v323_v46 = vld [vmem:[#allocation7 + $0x88] sm:$0xff] }
  0x45   : > { %404 = vmatpush.msrb.mxu2 %v332_v19  ;;  %384 = vmatpush.msra.mxu1 %v373_v20  ;;  %v448_v42 = vld [vmem:[#allocation7 + $0x118] sm:$0xff]  ;;  %v447_v45 = vld [vmem:[#allocation7 + $0x110] sm:$0xff]  ;;  %v364_v47 = vld [vmem:[#allocation7 + $0x8] sm:$0xff] }
  0x46   : > { %466 = vmatpush.msra.mxu0 %v455_v21  ;;  %v322_v48 = vld [vmem:[#allocation7 + $0x80] sm:$0xff]  ;;  %v446_v50 = vld [vmem:[#allocation7 + $0x108] sm:$0xff]  ;;  %v504_v52 = vld [vmem:[#allocation8 + $0xf8] sm:$0xff] }
  0x47   : > { %405 = vmatpush.msrb.mxu2 %v331_v22  ;;  %385 = vmatpush.msra.mxu1 %v372_v23  ;;  %v363_v49 = vld [vmem:[#allocation7] sm:$0xff]  ;;  %v503_v53 = vld [vmem:[#allocation8 + $0xf0] sm:$0xff]  ;;  %v502_v54 = vld [vmem:[#allocation8 + $0xe8] sm:$0xff] }
  0x48   : > { %467 = vmatpush.msra.mxu0 %v454_v25  ;;  %v445_v51 = vld [vmem:[#allocation7 + $0x100] sm:$0xff]  ;;  %v500_v56 = vld [vmem:[#allocation8 + $0xd8] sm:$0xff]  ;;  %v499_v57 = vld [vmem:[#allocation8 + $0xd0] sm:$0xff] }
  0x49   : > { %406 = vmatpush.msrb.mxu2 %v330_v24  ;;  %386 = vmatpush.msra.mxu1 %v371_v26  ;;  %v501_v55 = vld [vmem:[#allocation8 + $0xe0] sm:$0xff]  ;;  %v498_v58 = vld [vmem:[#allocation8 + $0xc8] sm:$0xff]  ;;  %v496_v60 = vld [vmem:[#allocation8 + $0xb8] sm:$0xff] }
  0x4a   : > { %468 = vmatpush.msra.mxu0 %v453_v27  ;;  %v497_v59 = vld [vmem:[#allocation8 + $0xc0] sm:$0xff]  ;;  %v495_v61 = vld [vmem:[#allocation8 + $0xb0] sm:$0xff]  ;;  %v494_v62 = vld [vmem:[#allocation8 + $0xa8] sm:$0xff] }
  0x4b   : > { %407 = vmatpush.msrb.mxu2 %v329_v28  ;;  %387 = vmatpush.msra.mxu1 %v370_v29  ;;  %v493_v4 = vld [vmem:[#allocation8 + $0xa0] sm:$0xff]  ;;  %v492_v5 = vld [vmem:[#allocation8 + $0x98] sm:$0xff]  ;;  %v491_v6 = vld [vmem:[#allocation8 + $0x90] sm:$0xff] }
  0x4c   : > { %469 = vmatpush.msra.mxu0 %v452_v30  ;;  %v490_v7 = vld [vmem:[#allocation8 + $0x88] sm:$0xff]  ;;  %v489_v8 = vld [vmem:[#allocation8 + $0x80] sm:$0xff]  ;;  %v617_v9 = vld [vmem:[#allocation8 + $0x178] sm:$0xff] }
  0x4d   : > { %408 = vmatpush.msrb.mxu2 %v328_v31  ;;  %388 = vmatpush.msra.mxu1 %v369_v32  ;;  %v616_v10 = vld [vmem:[#allocation8 + $0x170] sm:$0xff]  ;;  %v615_v11 = vld [vmem:[#allocation8 + $0x168] sm:$0xff]  ;;  %v614_v12 = vld [vmem:[#allocation8 + $0x160] sm:$0xff] }
  0x4e   : > { %470 = vmatpush.msra.mxu0 %v451_v33  ;;  %v613_v13 = vld [vmem:[#allocation8 + $0x158] sm:$0xff]  ;;  %v612_v14 = vld [vmem:[#allocation8 + $0x150] sm:$0xff]  ;;  %v611_v16 = vld [vmem:[#allocation8 + $0x148] sm:$0xff] }
  0x4f   : > { %409 = vmatpush.msrb.mxu2 %v327_v34  ;;  %389 = vmatpush.msra.mxu1 %v368_v35  ;;  %v862_v20 = vld [vmem:[%s1290_s3] ss:$0 sm:$0xff]  ;;  %v610_v21 = vld [vmem:[#allocation8 + $0x140] sm:$0xff]  ;;  %v539_v26 = vld [vmem:[#allocation8 + $0x70] sm:$0xff] }
  0x50   : > { %471 = vmatpush.msra.mxu0 %v450_v36  ;;  %v540_v25 = vld [vmem:[#allocation8 + $0x78] sm:$0xff]  ;;  %v538_v27 = vld [vmem:[#allocation8 + $0x68] sm:$0xff]  ;;  %v537_v28 = vld [vmem:[#allocation8 + $0x60] sm:$0xff] }
  0x51   : > { %410 = vmatpush.msrb.mxu2 %v326_v37  ;;  %390 = vmatpush.msra.mxu1 %v367_v38  ;;  %v536_v29 = vld [vmem:[#allocation8 + $0x58] sm:$0xff]  ;;  %v535_v30 = vld [vmem:[#allocation8 + $0x50] sm:$0xff]  ;;  %v534_v31 = vld [vmem:[#allocation8 + $0x48] sm:$0xff] }
  0x52   : > { %472 = vmatpush.msra.mxu0 %v449_v39  ;;  %v533_v32 = vld [vmem:[#allocation8 + $0x40] sm:$0xff]  ;;  %v532_v33 = vld [vmem:[#allocation8 + $0x38] sm:$0xff]  ;;  %v530_v34 = vld [vmem:[#allocation8 + $0x28] sm:$0xff] }
  0x53   : > { %411 = vmatpush.msrb.mxu2 %v325_v40  ;;  %391 = vmatpush.msra.mxu1 %v366_v41  ;;  %v528_v35 = vld [vmem:[#allocation8 + $0x18] sm:$0xff]  ;;  %v527_v37 = vld [vmem:[#allocation8 + $0x10] sm:$0xff]  ;;  %v526_v39 = vld [vmem:[#allocation8 + $0x8] sm:$0xff] }
  0x54   : > { %473 = vmatpush.msra.mxu0 %v448_v42  ;;  %v609_v36 = vld [vmem:[#allocation8 + $0x138] sm:$0xff]  ;;  %v608_v38 = vld [vmem:[#allocation8 + $0x130] sm:$0xff]  ;;  %v607_v40 = vld [vmem:[#allocation8 + $0x128] sm:$0xff] }
  0x55   : > { %412 = vmatpush.msrb.mxu2 %v324_v43  ;;  %392 = vmatpush.msra.mxu1 %v365_v44  ;;  %v525_v41 = vld [vmem:[#allocation8] sm:$0xff]  ;;  %v605_v43 = vld [vmem:[#allocation8 + $0x118] sm:$0xff]  ;;  %v604_v44 = vld [vmem:[#allocation8 + $0x110] sm:$0xff] }
  0x56   : > { %474 = vmatpush.msra.mxu0 %v447_v45  ;;  %v606_v42 = vld [vmem:[#allocation8 + $0x120] sm:$0xff]  ;;  %v603_v45 = vld [vmem:[#allocation8 + $0x108] sm:$0xff] }
  0x57   : > { %413 = vmatpush.msrb.mxu2 %v323_v46  ;;  %393 = vmatpush.msra.mxu1 %v364_v47  ;;  %v602_v46 = vld [vmem:[#allocation8 + $0x100] sm:$0xff] }
  0x58   : > { %475 = vmatpush.msra.mxu0 %v446_v50 }
  0x59   : > { %414 = vmatpush.msrb.mxu2 %v322_v48  ;;  %394 = vmatpush.msra.mxu1 %v363_v49 }
  0x5a   : > { %415 = vmatmul.f32.vlgmr.msrb.gmra.mxu2 %v1228_v1  ;;  %476 = vmatpush.msra.mxu0 %v445_v51 }
  0x5b   : > { %561 = vmatpush.msrb.mxu1 %v504_v52 }
  0x5c   : > { %618 = vmatpush.msrb.mxu0 %v617_v9 }
  0x5d   : > { %562 = vmatpush.msrb.mxu1 %v503_v53  ;;  %v863_v53 = vld [vmem:[%s1292_s5] ss:$0 sm:$0xff] }
  0x5e   : > { %619 = vmatpush.msrb.mxu0 %v616_v10 }
  0x5f   : > { %563 = vmatpush.msrb.mxu1 %v502_v54 }
  0x60   : > { %620 = vmatpush.msrb.mxu0 %v615_v11 }
  0x61   : > { %564 = vmatpush.msrb.mxu1 %v501_v55 }
  0x62   : > { %621 = vmatpush.msrb.mxu0 %v614_v12 }
  0x63   : > { %565 = vmatpush.msrb.mxu1 %v500_v56 }
  0x64   : > { %622 = vmatpush.msrb.mxu0 %v613_v13 }
  0x65   : > { %566 = vmatpush.msrb.mxu1 %v499_v57 }
  0x66   : > { %623 = vmatpush.msrb.mxu0 %v612_v14 }
  0x67   : > { %567 = vmatpush.msrb.mxu1 %v498_v58 }
  0x68   : > { %624 = vmatpush.msrb.mxu0 %v611_v16 }
  0x69   : > { %568 = vmatpush.msrb.mxu1 %v497_v59 }
  0x6a   : > { %625 = vmatpush.msrb.mxu0 %v610_v21 }
  0x6b   : > { %569 = vmatpush.msrb.mxu1 %v496_v60 }
  0x6c   : > { %626 = vmatpush.msrb.mxu0 %v609_v36 }
  0x6d   : > { %570 = vmatpush.msrb.mxu1 %v495_v61 }
  0x6e   : > { %627 = vmatpush.msrb.mxu0 %v608_v38 }
  0x6f   : > { %571 = vmatpush.msrb.mxu1 %v494_v62 }
  0x70   : > { %628 = vmatpush.msrb.mxu0 %v607_v40 }
  0x71   : > { %572 = vmatpush.msrb.mxu1 %v493_v4 }
  0x72   : > { %629 = vmatpush.msrb.mxu0 %v606_v42 }
  0x73   : > { %573 = vmatpush.msrb.mxu1 %v492_v5 }
  0x74   : > { %630 = vmatpush.msrb.mxu0 %v605_v43 }
  0x75   : > { %574 = vmatpush.msrb.mxu1 %v491_v6 }
  0x76   : > { %631 = vmatpush.msrb.mxu0 %v604_v44 }
  0x77   : > { %575 = vmatpush.msrb.mxu1 %v490_v7 }
  0x78   : > { %632 = vmatpush.msrb.mxu0 %v603_v45 }
  0x79   : > { %576 = vmatpush.msrb.mxu1 %v489_v8 }
  0x7a   : > { %633 = vmatpush.msrb.mxu0 %v602_v46 }
  0xbd   : > { %v360_v63 = vpop.f32.mrf.mxu2  ;;  %v441_v1 = vpop.f32.mrf.mxu3 }
  0xbe   : > { %395 = vmatmul.f32.vlgmr.msra.gmra.mxu1 %v360_v63  ;;  %477 = vmatmul.f32.vlgmr.msra.gmra.mxu0 %v441_v1 }
  0xdd   : > { %v416_v15 = vpop.f32.mrf.mxu2 }
 0x13b   : > { %v396_v17 = vpop.f32.mrf.mxu1  ;;  %v478_v18 = vpop.f32.mrf.mxu0 }
 0x13c   : > { %v417_v19 = vadd.f32 %v416_v15, %v396_v17 }
 0x13e   : > { %v481_v22 = vadd.f32 %v478_v18, %v417_v19 }
 0x140   : > { %v486_v23 = vadd.f32 %v862_v20, %v481_v22 }
 0x142   : > { %v487_v24 = vmax.f32 %v486_v23, 0.0 }
 0x144   : > { %520 = vmatpush.msrb.mxu3 %v487_v24  ;;  %577 = vmatmul.f32.vlgmr.msrb.gmra.mxu1 %v487_v24 }
 0x145   : > { %596 = vmatpush.msra.mxu2 %v487_v24  ;;  %777 = vmatmul.msk.f32.vlgmr.msrb.gmra.mxu3 %vm339_vm0, %v1230_v2  ;;  %v531_v2 = vld [vmem:[#allocation8 + $0x30] sm:$0xff] }
 0x146   : > { %778 = vmatmul.msk.f32.vlgmr.msra.gmra.mxu2 %vm339_vm0, %v1232_v3  ;;  %541 = vmatpush.msra.mxu3 %v540_v25  ;;  %v529_v3 = vld [vmem:[#allocation8 + $0x20] sm:$0xff] }
 0x148   : > { %542 = vmatpush.msra.mxu3 %v539_v26 }
 0x14a   : > { %543 = vmatpush.msra.mxu3 %v538_v27 }
 0x14c   : > { %544 = vmatpush.msra.mxu3 %v537_v28 }
 0x14e   : > { %545 = vmatpush.msra.mxu3 %v536_v29 }
 0x150   : > { %546 = vmatpush.msra.mxu3 %v535_v30 }
 0x152   : > { %547 = vmatpush.msra.mxu3 %v534_v31 }
 0x154   : > { %548 = vmatpush.msra.mxu3 %v533_v32 }
 0x156   : > { %549 = vmatpush.msra.mxu3 %v532_v33 }
 0x158   : > { %550 = vmatpush.msra.mxu3 %v531_v2 }
 0x15a   : > { %551 = vmatpush.msra.mxu3 %v530_v34 }
 0x15c   : > { %552 = vmatpush.msra.mxu3 %v529_v3 }
 0x15e   : > { %553 = vmatpush.msra.mxu3 %v528_v35 }
 0x160   : > { %554 = vmatpush.msra.mxu3 %v527_v37 }
 0x162   : > { %555 = vmatpush.msra.mxu3 %v526_v39 }
 0x164   : > { %556 = vmatpush.msra.mxu3 %v525_v41 }
 0x1c1   : > { %v578_v49 = vpop.f32.mrf.mxu1 }
 0x1c8   : > { %v522_v47 = vpop.f32.mrf.mxu3 }
 0x1c9   : > { %557 = vmatmul.f32.vlgmr.msra.gmra.mxu3 %v522_v47  ;;  %v598_v48 = vpop.f32.mrf.mxu2 }
 0x1ca   : > { %634 = vmatmul.f32.vlgmr.msrb.gmra.mxu0 %v598_v48 }
 0x247   : > { %v635_v51 = vpop.f32.mrf.mxu0 }
 0x24c   : > { %v558_v50 = vpop.f32.mrf.mxu3 }
 0x24d   : > { %v579_v52 = vadd.f32 %v578_v49, %v558_v50 }
 0x24f   : > { %v638_v54 = vadd.f32 %v635_v51, %v579_v52 }
 0x251   : > { %v643_v55 = vadd.f32 %v863_v53, %v638_v54 }
 0x253   : > { %v644_v56 = vadd.f32 %v643_v55, %v1225_v0 }
 0x255   : > { %645 = vst [vmem:[%s318_s12] sm:$0xff] %v644_v56 }
 0x256   : > { %1011 = shalt.err (!%p1008_p9)
}
 0x257   : > { %797 = dma.vmem_to_hbm [thread:$0]  (%p1176_p13), %s660_s15, 128, %s662_s16, %s647_s28  }
 0x258 PF: > { %s673_s10 = sand.u32 1, %s1046_s21   ;;  %p1300_p10 = scmp.ge.s32.totalorder %s1058_s24, 2 }
 0x259   : > { %s674_s20 = scalar_lea.sflag [#allocation4], %s673_s10 }
 0x25a   : > { %p814_p11 = pnand %p1300_p10, %p1181_p4 }
 0x25c   : > { %p815_p0 = pneg %p814_p11 }
 0x25e   : > { %1041 = dma.done.wait (%p815_p0), %s674_s20, 128  }
 0x25f   : > { %1043 = vsyncadd (%p815_p0), %s674_s20, 4294967168  ;;  %p21_p2 = scmp.ge.s32.totalorder %s1156_s26, 4   ;;  %s1301_s21 = smov %s1050_s22 }
 0x260   : > { %s1302_s22 = smov %s1054_s23  ;;  %s1303_s23 = smov %s1168_s7 }
 0x261   : > { %s1304_s24 = smov %s1156_s26  ;;  %23 = sbr.rel (!%p21_p2) target bundleno = 7 (0x7), region = 106 }
 0x266   :  { %680 = vsyncpa [#allocation3], 1 }
 0x267   :  { %682 = vsyncpa [#allocation3 + $0x1], 1 }
 0x268   :  { %683 = vsyncpa [#allocation6], 1 }
 0x269   :  { %684 = vsyncpa [#allocation9], 1 }
 0x26a   :  { %685 = vsyncpa [#allocation4], 1 }
 0x26b   :  { %687 = vsyncpa [#allocation4 + $0x1], 1 }

</bundles_post_ra>
